<compile_context>
chip_gen: v7x
topology: tpu7x:2x2x1
jax: 0.10.0
libtpu: 0.0.40
codegen_flags: <defaults>
</compile_context>

<pallas_src>
import functools

import jax
import jax.numpy as jnp
import numpy as np
from jax import lax
from jax.experimental import pallas as pl
from jax.experimental.pallas import tpu as pltpu


def _relu6(v):
    return jnp.minimum(jnp.maximum(v, 0.0), 6.0)


# ----------------------------------------------------------------------------
# Pallas kernel: InvertedResidualBlock forward for one batch element.
# Refs (after Squeezed batch dim):
#   x_ref  : (c_in,  H*W)    input, lane dim = flattened spatial (lane dense)
#   w1_ref : (hidden, c_in)  expand 1x1 conv weight (PyTorch OI layout)
#   dw_ref : (hidden, 9)     depthwise 3x3 weight, taps flattened row-major
#   w2_ref : (c_out, hidden) project 1x1 conv weight (PyTorch OI layout)
#   o_ref  : (c_out, H*W)    output
# ----------------------------------------------------------------------------
def inverted_residual_kernel(x_ref, w1_ref, dw_ref, w2_ref, o_ref, *, H, W):
    c_in, HW = x_ref.shape
    hidden = w1_ref.shape[0]

    x = x_ref[...].astype(jnp.float32)
    w1 = w1_ref[...].astype(jnp.float32)
    dw = dw_ref[...].astype(jnp.float32)
    w2 = w2_ref[...].astype(jnp.float32)

    # ---- 1x1 expand (+ ReLU6) as VPU broadcast MACs: h[d,l] = sum_c w1[d,c]*x[c,l]
    h = w1[:, 0:1] * x[0:1, :]
    for ci in range(1, c_in):
        h = h + w1[:, ci:ci + 1] * x[ci:ci + 1, :]
    h = _relu6(h)                                        # (hidden, HW)

    # ---- boundary masks for ReflectionPad2d(1) on the flattened H*W axis ----
    pos = lax.broadcasted_iota(jnp.int32, (1, HW), 1)
    col = pos % W                                        # W power-of-two here -> AND
    is_col0 = col == 0
    is_colW = col == (W - 1)
    is_row0 = pos < W
    is_rowH = pos >= (HW - W)

    # vertical neighbours (rows i-1 / i+1) with reflection at first/last row
    h_rp1 = pltpu.roll(h, HW - W, 1)                     # value at row i+1 (wraps at bottom)
    h_rm1 = pltpu.roll(h, W, 1)                          # value at row i-1 (wraps at top)
    v_rows = (jnp.where(is_row0, h_rp1, h_rm1),          # source row reflect(i-1)
              h,                                         # source row i
              jnp.where(is_rowH, h_rm1, h_rp1))          # source row reflect(i+1)

    # depthwise 3x3 (cross-correlation); accumulator starts on the centre tap
    acc = h * dw[:, 4:5]
    for di_idx, v in enumerate(v_rows):
        v_cp1 = pltpu.roll(v, HW - 1, 1)                 # col j+1 (wraps across rows)
        v_cm1 = pltpu.roll(v, 1, 1)                      # col j-1 (wraps across rows)
        taps = (jnp.where(is_col0, v_cp1, v_cm1),        # source col reflect(j-1)
                v,                                       # source col j
                jnp.where(is_colW, v_cm1, v_cp1))        # source col reflect(j+1)
        for dj_idx, t in enumerate(taps):
            k = di_idx * 3 + dj_idx
            if k == 4:
                continue                                 # centre tap already in acc
            acc = acc + t * dw[:, k:k + 1]
    y = _relu6(acc)                                      # (hidden, HW)

    # ---- 1x1 project (+ ReLU6) as VPU broadcast MACs ----
    out = w2[:, 0:1] * y[0:1, :]
    for d in range(1, hidden):
        out = out + w2[:, d:d + 1] * y[d:d + 1, :]
    o_ref[...] = _relu6(out).astype(o_ref.dtype)


# ----------------------------------------------------------------------------
# Wrapper: accepts NCHW input and PyTorch-shaped weights, dispatches the kernel.
# ----------------------------------------------------------------------------
def inverted_residual_forward(x_nchw, w1, dw, w2):
    """x_nchw: (B, c_in, H, W); w1: (hidden, c_in, 1, 1);
    dw: (hidden, 1, 3, 3); w2: (c_out, hidden, 1, 1)."""
    B, c_in, H, W = x_nchw.shape
    hidden = w1.shape[0]
    c_out = w2.shape[0]
    HW = H * W
    assert H >= 2 and W >= 2, "ReflectionPad2d(1) requires H, W >= 2"

    x = x_nchw.reshape(B, c_in, HW)        # free row-major reshape, no transpose
    w1_2d = w1.reshape(hidden, c_in)
    dw_2d = dw.reshape(hidden, 9)
    w2_2d = w2.reshape(c_out, hidden)

    kernel = functools.partial(inverted_residual_kernel, H=H, W=W)

    out = pl.pallas_call(
        kernel,
        out_shape=jax.ShapeDtypeStruct((B, c_out, HW), x_nchw.dtype),
        grid_spec=pltpu.PrefetchScalarGridSpec(
            num_scalar_prefetch=0,
            grid=(B,),                     # parallel over batch (uses both TCs on v7x)
            in_specs=[
                pl.BlockSpec((pl.Squeezed(), c_in, HW), lambda b: (b, 0, 0)),
                pl.BlockSpec((hidden, c_in), lambda b: (0, 0)),
                pl.BlockSpec((hidden, 9), lambda b: (0, 0)),
                pl.BlockSpec((c_out, hidden), lambda b: (0, 0)),
            ],
            out_specs=pl.BlockSpec((pl.Squeezed(), c_out, HW), lambda b: (b, 0, 0)),
        ),
        compiler_params=pltpu.CompilerParams(
            dimension_semantics=("parallel",)),
    )(x, w1_2d, dw_2d, w2_2d)

    return out.reshape(B, c_out, H, W)


# ----------------------------------------------------------------------------
# Pure-JAX reference (NCHW, lax convolutions) to validate semantics.
# ----------------------------------------------------------------------------
def inverted_residual_reference(x, w1, dw, w2):
    dn = ('NCHW', 'OIHW', 'NCHW')
    hidden = w1.shape[0]
    hi = lax.conv_general_dilated(x, w1, (1, 1), 'VALID', dimension_numbers=dn,
                                  precision=lax.Precision.HIGHEST)
    hi = jnp.clip(hi, 0.0, 6.0)
    hp = jnp.pad(hi, ((0, 0), (0, 0), (1, 1), (1, 1)), mode='reflect')
    hi = lax.conv_general_dilated(hp, dw, (1, 1), 'VALID', dimension_numbers=dn,
                                  feature_group_count=hidden,
                                  precision=lax.Precision.HIGHEST)
    hi = jnp.clip(hi, 0.0, 6.0)
    out = lax.conv_general_dilated(hi, w2, (1, 1), 'VALID', dimension_numbers=dn,
                                   precision=lax.Precision.HIGHEST)
    return jnp.clip(out, 0.0, 6.0)


# ----------------------------------------------------------------------------
if __name__ == "__main__":
    B, c_in, H, W = 2, 4, 16, 16
    expand_ratio = 2
    hidden = c_in * expand_ratio           # 8
    c_out = 4

    key = jax.random.PRNGKey(0)
    kx, k1, kd, k2 = jax.random.split(key, 4)
    x = jax.random.normal(kx, (B, c_in, H, W), jnp.float32)      # NCHW, like PyTorch
    w1 = jax.random.normal(k1, (hidden, c_in, 1, 1), jnp.float32) * 0.3
    dw = jax.random.normal(kd, (hidden, 1, 3, 3), jnp.float32) * 0.3
    w2 = jax.random.normal(k2, (c_out, hidden, 1, 1), jnp.float32) * 0.3

    out = inverted_residual_forward(x, w1, dw, w2)
    jax.block_until_ready(out)

    ref = inverted_residual_reference(x, w1, dw, w2)
    np.testing.assert_allclose(np.asarray(out), np.asarray(ref), rtol=1e-4, atol=1e-4)

    print("KERNEL_OK")
</pallas_src>

<mosaic_0001>
module attributes {stable_mosaic.version = 11 : i64} {
  func.func @inverted_residual_kernel(%arg0: i32, %arg1: memref<1x4x256xf32, #tpu.memory_space<vmem>>, %arg2: memref<8x4xf32, #tpu.memory_space<vmem>>, %arg3: memref<8x9xf32, #tpu.memory_space<vmem>>, %arg4: memref<4x8xf32, #tpu.memory_space<vmem>>, %arg5: memref<1x4x256xf32, #tpu.memory_space<vmem>>) attributes {dimension_semantics = [#tpu.dimension_semantics<parallel>], iteration_bounds = array<i64: 2>, scalar_prefetch = 0 : i64, scratch_operands = 0 : i64, tpu.core_type = #tpu.core_type<tc>, window_params = [{transform_indices = @transform_0, window_bounds = array<i64: 1, 4, 256>}, {pipeline_mode = #tpu.pipeline_mode<synchronous>, transform_indices = @transform_1, window_bounds = array<i64: 8, 4>}, {pipeline_mode = #tpu.pipeline_mode<synchronous>, transform_indices = @transform_2, window_bounds = array<i64: 8, 9>}, {pipeline_mode = #tpu.pipeline_mode<synchronous>, transform_indices = @transform_3, window_bounds = array<i64: 4, 8>}, {transform_indices = @transform_4, window_bounds = array<i64: 1, 4, 256>}]} {
    %c0 = arith.constant 0 : index
    %c0_0 = arith.constant 0 : index
    %c0_1 = arith.constant 0 : index
    %0 = vector.load %arg1[%c0, %c0_0, %c0_1] : memref<1x4x256xf32, #tpu.memory_space<vmem>>, vector<1x4x256xf32>
    %1 = vector.shape_cast %0 : vector<1x4x256xf32> to vector<4x256xf32>
    %c0_2 = arith.constant 0 : index
    %c0_3 = arith.constant 0 : index
    %2 = vector.load %arg2[%c0_2, %c0_3] : memref<8x4xf32, #tpu.memory_space<vmem>>, vector<8x4xf32>
    %c0_4 = arith.constant 0 : index
    %c0_5 = arith.constant 0 : index
    %3 = vector.load %arg3[%c0_4, %c0_5] : memref<8x9xf32, #tpu.memory_space<vmem>>, vector<8x9xf32>
    %c0_6 = arith.constant 0 : index
    %c0_7 = arith.constant 0 : index
    %4 = vector.load %arg4[%c0_6, %c0_7] : memref<4x8xf32, #tpu.memory_space<vmem>>, vector<4x8xf32>
    %5 = vector.extract_strided_slice %2 {offsets = [0, 0], sizes = [8, 1], strides = [1, 1]} : vector<8x4xf32> to vector<8x1xf32>
    %6 = vector.extract_strided_slice %1 {offsets = [0, 0], sizes = [1, 256], strides = [1, 1]} : vector<4x256xf32> to vector<1x256xf32>
    %7 = vector.broadcast %5 : vector<8x1xf32> to vector<8x256xf32>
    %8 = vector.broadcast %6 : vector<1x256xf32> to vector<8x256xf32>
    %9 = arith.mulf %7, %8 : vector<8x256xf32>
    %10 = vector.extract_strided_slice %2 {offsets = [0, 1], sizes = [8, 1], strides = [1, 1]} : vector<8x4xf32> to vector<8x1xf32>
    %11 = vector.extract_strided_slice %1 {offsets = [1, 0], sizes = [1, 256], strides = [1, 1]} : vector<4x256xf32> to vector<1x256xf32>
    %12 = vector.broadcast %10 : vector<8x1xf32> to vector<8x256xf32>
    %13 = vector.broadcast %11 : vector<1x256xf32> to vector<8x256xf32>
    %14 = arith.mulf %12, %13 : vector<8x256xf32>
    %15 = arith.addf %9, %14 : vector<8x256xf32>
    %16 = vector.extract_strided_slice %2 {offsets = [0, 2], sizes = [8, 1], strides = [1, 1]} : vector<8x4xf32> to vector<8x1xf32>
    %17 = vector.extract_strided_slice %1 {offsets = [2, 0], sizes = [1, 256], strides = [1, 1]} : vector<4x256xf32> to vector<1x256xf32>
    %18 = vector.broadcast %16 : vector<8x1xf32> to vector<8x256xf32>
    %19 = vector.broadcast %17 : vector<1x256xf32> to vector<8x256xf32>
    %20 = arith.mulf %18, %19 : vector<8x256xf32>
    %21 = arith.addf %15, %20 : vector<8x256xf32>
    %22 = vector.extract_strided_slice %2 {offsets = [0, 3], sizes = [8, 1], strides = [1, 1]} : vector<8x4xf32> to vector<8x1xf32>
    %23 = vector.extract_strided_slice %1 {offsets = [3, 0], sizes = [1, 256], strides = [1, 1]} : vector<4x256xf32> to vector<1x256xf32>
    %24 = vector.broadcast %22 : vector<8x1xf32> to vector<8x256xf32>
    %25 = vector.broadcast %23 : vector<1x256xf32> to vector<8x256xf32>
    %26 = arith.mulf %24, %25 : vector<8x256xf32>
    %27 = arith.addf %21, %26 : vector<8x256xf32>
    %cst = arith.constant 0.000000e+00 : f32
    %28 = vector.broadcast %cst : f32 to vector<8x256xf32>
    %29 = arith.maximumf %27, %28 : vector<8x256xf32>
    %cst_8 = arith.constant 6.000000e+00 : f32
    %30 = vector.broadcast %cst_8 : f32 to vector<8x256xf32>
    %31 = arith.minimumf %29, %30 : vector<8x256xf32>
    %32 = tpu.iota {dimensions = array<i32: 1>} : vector<1x256xi32>
    %c16_i32 = arith.constant 16 : i32
    %c0_i32 = arith.constant 0 : i32
    %33 = arith.cmpi eq, %c16_i32, %c0_i32 : i32
    %c1_i32 = arith.constant 1 : i32
    %34 = arith.select %33, %c1_i32, %c16_i32 : i32
    %35 = vector.broadcast %34 : i32 to vector<1x256xi32>
    %36 = arith.remsi %32, %35 : vector<1x256xi32>
    %c0_i32_9 = arith.constant 0 : i32
    %37 = vector.broadcast %c0_i32_9 : i32 to vector<1x256xi32>
    %38 = arith.cmpi ne, %36, %37 : vector<1x256xi32>
    %c0_i32_10 = arith.constant 0 : i32
    %39 = vector.broadcast %c0_i32_10 : i32 to vector<1x256xi32>
    %40 = arith.cmpi slt, %36, %39 : vector<1x256xi32>
    %c0_i32_11 = arith.constant 0 : i32
    %41 = arith.cmpi slt, %34, %c0_i32_11 : i32
    %42 = vector.broadcast %41 : i1 to vector<1x256xi1>
    %43 = vector.broadcast %42 : vector<1x256xi1> to vector<1x256xi1>
    %44 = arith.xori %40, %43 : vector<1x256xi1>
    %45 = arith.andi %44, %38 : vector<1x256xi1>
    %46 = vector.broadcast %34 : i32 to vector<1x256xi32>
    %47 = arith.addi %36, %46 : vector<1x256xi32>
    %48 = arith.select %45, %47, %36 : vector<1x256xi1>, vector<1x256xi32>
    %c0_i32_12 = arith.constant 0 : i32
    %49 = vector.broadcast %c0_i32_12 : i32 to vector<1x256xi32>
    %50 = arith.cmpi eq, %48, %49 : vector<1x256xi32>
    %c15_i32 = arith.constant 15 : i32
    %51 = vector.broadcast %c15_i32 : i32 to vector<1x256xi32>
    %52 = arith.cmpi eq, %48, %51 : vector<1x256xi32>
    %c16_i32_13 = arith.constant 16 : i32
    %53 = vector.broadcast %c16_i32_13 : i32 to vector<1x256xi32>
    %54 = arith.cmpi slt, %32, %53 : vector<1x256xi32>
    %c240_i32 = arith.constant 240 : i32
    %55 = vector.broadcast %c240_i32 : i32 to vector<1x256xi32>
    %56 = arith.cmpi sge, %32, %55 : vector<1x256xi32>
    %c240_i32_14 = arith.constant 240 : i32
    %57 = tpu.dynamic_rotate %31 by %c240_i32_14 dim 1 : vector<8x256xf32>, i32 -> vector<8x256xf32>
    %c16_i32_15 = arith.constant 16 : i32
    %58 = tpu.dynamic_rotate %31 by %c16_i32_15 dim 1 : vector<8x256xf32>, i32 -> vector<8x256xf32>
    %59 = vector.shape_cast %54 : vector<1x256xi1> to vector<1x256xi1>
    %60 = vector.broadcast %59 : vector<1x256xi1> to vector<8x256xi1>
    %61 = arith.select %60, %57, %58 : vector<8x256xi1>, vector<8x256xf32>
    %62 = vector.shape_cast %56 : vector<1x256xi1> to vector<1x256xi1>
    %63 = vector.broadcast %62 : vector<1x256xi1> to vector<8x256xi1>
    %64 = arith.select %63, %58, %57 : vector<8x256xi1>, vector<8x256xf32>
    %65 = vector.extract_strided_slice %3 {offsets = [0, 4], sizes = [8, 1], strides = [1, 1]} : vector<8x9xf32> to vector<8x1xf32>
    %66 = vector.broadcast %65 : vector<8x1xf32> to vector<8x256xf32>
    %67 = arith.mulf %31, %66 : vector<8x256xf32>
    %c255_i32 = arith.constant 255 : i32
    %68 = tpu.dynamic_rotate %61 by %c255_i32 dim 1 : vector<8x256xf32>, i32 -> vector<8x256xf32>
    %c1_i32_16 = arith.constant 1 : i32
    %69 = tpu.dynamic_rotate %61 by %c1_i32_16 dim 1 : vector<8x256xf32>, i32 -> vector<8x256xf32>
    %70 = vector.shape_cast %50 : vector<1x256xi1> to vector<1x256xi1>
    %71 = vector.broadcast %70 : vector<1x256xi1> to vector<8x256xi1>
    %72 = arith.select %71, %68, %69 : vector<8x256xi1>, vector<8x256xf32>
    %73 = vector.shape_cast %52 : vector<1x256xi1> to vector<1x256xi1>
    %74 = vector.broadcast %73 : vector<1x256xi1> to vector<8x256xi1>
    %75 = arith.select %74, %69, %68 : vector<8x256xi1>, vector<8x256xf32>
    %76 = vector.extract_strided_slice %3 {offsets = [0, 0], sizes = [8, 1], strides = [1, 1]} : vector<8x9xf32> to vector<8x1xf32>
    %77 = vector.broadcast %76 : vector<8x1xf32> to vector<8x256xf32>
    %78 = arith.mulf %72, %77 : vector<8x256xf32>
    %79 = arith.addf %67, %78 : vector<8x256xf32>
    %80 = vector.extract_strided_slice %3 {offsets = [0, 1], sizes = [8, 1], strides = [1, 1]} : vector<8x9xf32> to vector<8x1xf32>
    %81 = vector.broadcast %80 : vector<8x1xf32> to vector<8x256xf32>
    %82 = arith.mulf %61, %81 : vector<8x256xf32>
    %83 = arith.addf %79, %82 : vector<8x256xf32>
    %84 = vector.extract_strided_slice %3 {offsets = [0, 2], sizes = [8, 1], strides = [1, 1]} : vector<8x9xf32> to vector<8x1xf32>
    %85 = vector.broadcast %84 : vector<8x1xf32> to vector<8x256xf32>
    %86 = arith.mulf %75, %85 : vector<8x256xf32>
    %87 = arith.addf %83, %86 : vector<8x256xf32>
    %c255_i32_17 = arith.constant 255 : i32
    %88 = tpu.dynamic_rotate %31 by %c255_i32_17 dim 1 : vector<8x256xf32>, i32 -> vector<8x256xf32>
    %c1_i32_18 = arith.constant 1 : i32
    %89 = tpu.dynamic_rotate %31 by %c1_i32_18 dim 1 : vector<8x256xf32>, i32 -> vector<8x256xf32>
    %90 = vector.shape_cast %50 : vector<1x256xi1> to vector<1x256xi1>
    %91 = vector.broadcast %90 : vector<1x256xi1> to vector<8x256xi1>
    %92 = arith.select %91, %88, %89 : vector<8x256xi1>, vector<8x256xf32>
    %93 = vector.shape_cast %52 : vector<1x256xi1> to vector<1x256xi1>
    %94 = vector.broadcast %93 : vector<1x256xi1> to vector<8x256xi1>
    %95 = arith.select %94, %89, %88 : vector<8x256xi1>, vector<8x256xf32>
    %96 = vector.extract_strided_slice %3 {offsets = [0, 3], sizes = [8, 1], strides = [1, 1]} : vector<8x9xf32> to vector<8x1xf32>
    %97 = vector.broadcast %96 : vector<8x1xf32> to vector<8x256xf32>
    %98 = arith.mulf %92, %97 : vector<8x256xf32>
    %99 = arith.addf %87, %98 : vector<8x256xf32>
    %100 = vector.extract_strided_slice %3 {offsets = [0, 5], sizes = [8, 1], strides = [1, 1]} : vector<8x9xf32> to vector<8x1xf32>
    %101 = vector.broadcast %100 : vector<8x1xf32> to vector<8x256xf32>
    %102 = arith.mulf %95, %101 : vector<8x256xf32>
    %103 = arith.addf %99, %102 : vector<8x256xf32>
    %c255_i32_19 = arith.constant 255 : i32
    %104 = tpu.dynamic_rotate %64 by %c255_i32_19 dim 1 : vector<8x256xf32>, i32 -> vector<8x256xf32>
    %c1_i32_20 = arith.constant 1 : i32
    %105 = tpu.dynamic_rotate %64 by %c1_i32_20 dim 1 : vector<8x256xf32>, i32 -> vector<8x256xf32>
    %106 = vector.shape_cast %50 : vector<1x256xi1> to vector<1x256xi1>
    %107 = vector.broadcast %106 : vector<1x256xi1> to vector<8x256xi1>
    %108 = arith.select %107, %104, %105 : vector<8x256xi1>, vector<8x256xf32>
    %109 = vector.shape_cast %52 : vector<1x256xi1> to vector<1x256xi1>
    %110 = vector.broadcast %109 : vector<1x256xi1> to vector<8x256xi1>
    %111 = arith.select %110, %105, %104 : vector<8x256xi1>, vector<8x256xf32>
    %112 = vector.extract_strided_slice %3 {offsets = [0, 6], sizes = [8, 1], strides = [1, 1]} : vector<8x9xf32> to vector<8x1xf32>
    %113 = vector.broadcast %112 : vector<8x1xf32> to vector<8x256xf32>
    %114 = arith.mulf %108, %113 : vector<8x256xf32>
    %115 = arith.addf %103, %114 : vector<8x256xf32>
    %116 = vector.extract_strided_slice %3 {offsets = [0, 7], sizes = [8, 1], strides = [1, 1]} : vector<8x9xf32> to vector<8x1xf32>
    %117 = vector.broadcast %116 : vector<8x1xf32> to vector<8x256xf32>
    %118 = arith.mulf %64, %117 : vector<8x256xf32>
    %119 = arith.addf %115, %118 : vector<8x256xf32>
    %120 = vector.extract_strided_slice %3 {offsets = [0, 8], sizes = [8, 1], strides = [1, 1]} : vector<8x9xf32> to vector<8x1xf32>
    %121 = vector.broadcast %120 : vector<8x1xf32> to vector<8x256xf32>
    %122 = arith.mulf %111, %121 : vector<8x256xf32>
    %123 = arith.addf %119, %122 : vector<8x256xf32>
    %cst_21 = arith.constant 0.000000e+00 : f32
    %124 = vector.broadcast %cst_21 : f32 to vector<8x256xf32>
    %125 = arith.maximumf %123, %124 : vector<8x256xf32>
    %cst_22 = arith.constant 6.000000e+00 : f32
    %126 = vector.broadcast %cst_22 : f32 to vector<8x256xf32>
    %127 = arith.minimumf %125, %126 : vector<8x256xf32>
    %128 = vector.extract_strided_slice %4 {offsets = [0, 0], sizes = [4, 1], strides = [1, 1]} : vector<4x8xf32> to vector<4x1xf32>
    %129 = vector.extract_strided_slice %127 {offsets = [0, 0], sizes = [1, 256], strides = [1, 1]} : vector<8x256xf32> to vector<1x256xf32>
    %130 = vector.broadcast %128 : vector<4x1xf32> to vector<4x256xf32>
    %131 = vector.broadcast %129 : vector<1x256xf32> to vector<4x256xf32>
    %132 = arith.mulf %130, %131 : vector<4x256xf32>
    %133 = vector.extract_strided_slice %4 {offsets = [0, 1], sizes = [4, 1], strides = [1, 1]} : vector<4x8xf32> to vector<4x1xf32>
    %134 = vector.extract_strided_slice %127 {offsets = [1, 0], sizes = [1, 256], strides = [1, 1]} : vector<8x256xf32> to vector<1x256xf32>
    %135 = vector.broadcast %133 : vector<4x1xf32> to vector<4x256xf32>
    %136 = vector.broadcast %134 : vector<1x256xf32> to vector<4x256xf32>
    %137 = arith.mulf %135, %136 : vector<4x256xf32>
    %138 = arith.addf %132, %137 : vector<4x256xf32>
    %139 = vector.extract_strided_slice %4 {offsets = [0, 2], sizes = [4, 1], strides = [1, 1]} : vector<4x8xf32> to vector<4x1xf32>
    %140 = vector.extract_strided_slice %127 {offsets = [2, 0], sizes = [1, 256], strides = [1, 1]} : vector<8x256xf32> to vector<1x256xf32>
    %141 = vector.broadcast %139 : vector<4x1xf32> to vector<4x256xf32>
    %142 = vector.broadcast %140 : vector<1x256xf32> to vector<4x256xf32>
    %143 = arith.mulf %141, %142 : vector<4x256xf32>
    %144 = arith.addf %138, %143 : vector<4x256xf32>
    %145 = vector.extract_strided_slice %4 {offsets = [0, 3], sizes = [4, 1], strides = [1, 1]} : vector<4x8xf32> to vector<4x1xf32>
    %146 = vector.extract_strided_slice %127 {offsets = [3, 0], sizes = [1, 256], strides = [1, 1]} : vector<8x256xf32> to vector<1x256xf32>
    %147 = vector.broadcast %145 : vector<4x1xf32> to vector<4x256xf32>
    %148 = vector.broadcast %146 : vector<1x256xf32> to vector<4x256xf32>
    %149 = arith.mulf %147, %148 : vector<4x256xf32>
    %150 = arith.addf %144, %149 : vector<4x256xf32>
    %151 = vector.extract_strided_slice %4 {offsets = [0, 4], sizes = [4, 1], strides = [1, 1]} : vector<4x8xf32> to vector<4x1xf32>
    %152 = vector.extract_strided_slice %127 {offsets = [4, 0], sizes = [1, 256], strides = [1, 1]} : vector<8x256xf32> to vector<1x256xf32>
    %153 = vector.broadcast %151 : vector<4x1xf32> to vector<4x256xf32>
    %154 = vector.broadcast %152 : vector<1x256xf32> to vector<4x256xf32>
    %155 = arith.mulf %153, %154 : vector<4x256xf32>
    %156 = arith.addf %150, %155 : vector<4x256xf32>
    %157 = vector.extract_strided_slice %4 {offsets = [0, 5], sizes = [4, 1], strides = [1, 1]} : vector<4x8xf32> to vector<4x1xf32>
    %158 = vector.extract_strided_slice %127 {offsets = [5, 0], sizes = [1, 256], strides = [1, 1]} : vector<8x256xf32> to vector<1x256xf32>
    %159 = vector.broadcast %157 : vector<4x1xf32> to vector<4x256xf32>
    %160 = vector.broadcast %158 : vector<1x256xf32> to vector<4x256xf32>
    %161 = arith.mulf %159, %160 : vector<4x256xf32>
    %162 = arith.addf %156, %161 : vector<4x256xf32>
    %163 = vector.extract_strided_slice %4 {offsets = [0, 6], sizes = [4, 1], strides = [1, 1]} : vector<4x8xf32> to vector<4x1xf32>
    %164 = vector.extract_strided_slice %127 {offsets = [6, 0], sizes = [1, 256], strides = [1, 1]} : vector<8x256xf32> to vector<1x256xf32>
    %165 = vector.broadcast %163 : vector<4x1xf32> to vector<4x256xf32>
    %166 = vector.broadcast %164 : vector<1x256xf32> to vector<4x256xf32>
    %167 = arith.mulf %165, %166 : vector<4x256xf32>
    %168 = arith.addf %162, %167 : vector<4x256xf32>
    %169 = vector.extract_strided_slice %4 {offsets = [0, 7], sizes = [4, 1], strides = [1, 1]} : vector<4x8xf32> to vector<4x1xf32>
    %170 = vector.extract_strided_slice %127 {offsets = [7, 0], sizes = [1, 256], strides = [1, 1]} : vector<8x256xf32> to vector<1x256xf32>
    %171 = vector.broadcast %169 : vector<4x1xf32> to vector<4x256xf32>
    %172 = vector.broadcast %170 : vector<1x256xf32> to vector<4x256xf32>
    %173 = arith.mulf %171, %172 : vector<4x256xf32>
    %174 = arith.addf %168, %173 : vector<4x256xf32>
    %cst_23 = arith.constant 0.000000e+00 : f32
    %175 = vector.broadcast %cst_23 : f32 to vector<4x256xf32>
    %176 = arith.maximumf %174, %175 : vector<4x256xf32>
    %cst_24 = arith.constant 6.000000e+00 : f32
    %177 = vector.broadcast %cst_24 : f32 to vector<4x256xf32>
    %178 = arith.minimumf %176, %177 : vector<4x256xf32>
    %c0_25 = arith.constant 0 : index
    %c0_26 = arith.constant 0 : index
    %c0_27 = arith.constant 0 : index
    %179 = vector.load %arg5[%c0_25, %c0_26, %c0_27] : memref<1x4x256xf32, #tpu.memory_space<vmem>>, vector<1x4x256xf32>
    %180 = vector.shape_cast %179 : vector<1x4x256xf32> to vector<4x256xf32>
    %181 = vector.shape_cast %178 : vector<4x256xf32> to vector<1x4x256xf32>
    tpu.vector_store %arg5[%c0_25, %c0_26, %c0_27], %181 {strides = array<i32>} : memref<1x4x256xf32, #tpu.memory_space<vmem>>, vector<1x4x256xf32>,
    return
  }
  func.func @transform_0(%arg0: i32) -> (i32, i32, i32) {
    %c0_i32 = arith.constant 0 : i32
    %c0_i32_0 = arith.constant 0 : i32
    %c0_i32_1 = arith.constant 0 : i32
    return %arg0, %c0_i32, %c0_i32_0 : i32, i32, i32
  }
  func.func @transform_1(%arg0: i32) -> (i32, i32) {
    %c0_i32 = arith.constant 0 : i32
    %c0_i32_0 = arith.constant 0 : i32
    %c0_i32_1 = arith.constant 0 : i32
    return %c0_i32, %c0_i32_0 : i32, i32
  }
  func.func @transform_2(%arg0: i32) -> (i32, i32) {
    %c0_i32 = arith.constant 0 : i32
    %c0_i32_0 = arith.constant 0 : i32
    %c0_i32_1 = arith.constant 0 : i32
    return %c0_i32, %c0_i32_0 : i32, i32
  }
  func.func @transform_3(%arg0: i32) -> (i32, i32) {
    %c0_i32 = arith.constant 0 : i32
    %c0_i32_0 = arith.constant 0 : i32
    %c0_i32_1 = arith.constant 0 : i32
    return %c0_i32, %c0_i32_0 : i32, i32
  }
  func.func @transform_4(%arg0: i32) -> (i32, i32, i32) {
    %c0_i32 = arith.constant 0 : i32
    %c0_i32_0 = arith.constant 0 : i32
    %c0_i32_1 = arith.constant 0 : i32
    return %arg0, %c0_i32, %c0_i32_0 : i32, i32, i32
  }
}

</mosaic_0001>

<bundles_post_ra>
// kernel: tpu_custom_call.1
= control target key start
LH: loop header
LB: loop body
LE: loop exit
PB: predicated region body
PF: predicated region fallthrough
CT: control target
= control target key end

     0   :  { %9 = vsyncpa [#allocation3], 0  ;;  %s1340_s0 = inlined_call_operand.hbm [shape: f32[2,4,256], index: 0, kind: input, shape index: {}]   ;;  %s1341_s1 = inlined_call_operand.vmem [shape: f32[8,4], index: 1, kind: input, shape index: {}]   ;;  %s1342_s2 = inlined_call_operand.vmem [shape: f32[8,9], index: 2, kind: input, shape index: {}]   ;;  %s1343_s3 = inlined_call_operand.vmem [shape: f32[4,8], index: 3, kind: input, shape index: {}]   ;;  %s1344_s4 = inlined_call_operand.hbm [shape: f32[2,4,256], index: 4, kind: output, shape index: {}]  }
   0x1   :  { %11 = vsyncpa [#allocation3 + $0x1], 0 }
   0x2   :  { %12 = vsyncpa [#allocation4], 0 }
   0x3   :  { %14 = vsyncpa [#allocation4 + $0x1], 0  ;;  %s974_s15 = smov 0   ;;  %s976_s16 = smov 0  }
   0x4   :  { %s978_s17 = smov 0   ;;  %s980_s18 = smov 0  }
   0x5 LB: > { %s995_s19 = sadd.s32 4294967295, %s932_s18   ;;  %s740_s20 = sadd.s32 4294967294, %s932_s18   ;;  %s932_s18 = sphi %s980_s18, %s1367_s18   ;;  %s928_s17 = sphi %s978_s17, %s1366_s17   ;;  %s924_s16 = sphi %s976_s16, %s1365_s16   ;;  %s920_s15 = sphi %s974_s15, %s1364_s15  }
   0x6   : > { %s999_s21 = sadd.s32 1, %s932_s18   ;;  %s27_s22 = sadd.s32 1, %s928_s17 }
   0x7   : > { %s24_s23 = ssub.s32 %s932_s18, %s999_s21  ;;  %p34_p0 = scmp.ne.s32.totalorder %s928_s17, %s924_s16 }
   0x8   : > { %p25_p1 = scmp.eq.s32.totalorder %s24_s23, 0  ;;  %p35_p2 = scmp.eq.s32.totalorder %s932_s18, 0 }
   0x9   : > { %p40_p3 = scmp.ne.s32.totalorder %s924_s16, %s920_s15  ;;  %p41_p4 = scmp.eq.s32.totalorder %s995_s19, 0 }
   0xa   : > { %s1011_s24 = scalar_select %p25_p1, %s928_s17, %s27_s22  }
   0xb   : > { %p1013_p5 = por %p35_p2, %p34_p0  ;;  %p1017_p6 = por %p41_p4, %p40_p3 }
   0xc   : > { %p127_p7 = scmp.eq.s32.totalorder %s995_s19, 1  ;;  %p133_p8 = scmp.eq.s32.totalorder %s740_s20, 1 }
   0xd   : > { %p768_p10 = scmp.lt.s32.totalorder %s932_s18, 2  ;;  %s162_s29 = sand.u32 1, %s928_s17  }
   0xe   : > { %p1024_p11 = por %p127_p7, %p34_p0  ;;  %p1028_p12 = por %p133_p8, %p40_p3 }
   0xf   : > { %s754_s30 = sshll.u32 %s932_s18, 7  ;;  %s743_s5 = sshll.u32 %s162_s29, 3 }
  0x10   : > { %s1348_s27 = scalar_select %p1024_p11, 1, 0 }
  0x11   : > { %s1349_s28 = scalar_select %p1028_p12, 1, 0 }
  0x12   : > { %s1037_s8 = scalar_lea.hbm %s1340_s0, %s754_s30  ;;  %s166_s9 = scalar_lea.vmem [#allocation2], %s743_s5 }
  0x13   : > { %s174_s10 = sshll.u32 %s166_s9, 4  ;;  %p1041_p13 = pnand %p768_p10, %p1013_p5  ;;  %s1045_s10 = int_to_ptr.vmem [resolvable:$true] %s174_s10 }
  0x14   : > { %s163_s12 = scalar_lea.sflag [#allocation3], %s162_s29  ;;  %s836_s13 = scalar_lea.hbm %s1037_s8, 128 }
  0x15   : > { %p837_p2 = scmp.ne.s32.totalorder %s1037_s8, %s836_s13  ;;  %p838_p3 = pneg %p1041_p13 }
  0x16   : > { %s841_s22 = scalar_lea.hbm %s1340_s0, 256  ;;  %p842_p5 = scmp.lt.u32.totalorder %s1037_s8, %s1340_s0 }
  0x17   : > { %p839_p4 = pnand %p838_p3, %p837_p2  ;;  %p843_p8 = scmp.lt.u32.totalorder %s841_s22, %s836_s13 }
  0x18   : > { %p845_p9 = scmp.lt.u32.totalorder %s836_s13, %s1037_s8 }
  0x19   : > { %p840_p7 = pneg %p839_p4  ;;  %p844_p10 = por %p843_p8, %p842_p5 }
  0x1b   : > { %p846_p0 = por %p845_p9, %p844_p10 }
  0x1d   : > { %p847_p1 = pnand %p846_p0, %p840_p7 }
  0x1f   : > { %850 = shalt.err (!%p847_p1)
}
  0x20   : > { %s851_s29 = scalar_lea.vmem %s1045_s10, 128  ;;  %s934_s30 = smov [#allocation2]  }
  0x21   : > { %p852_p2 = scmp.ne.s32.totalorder %s1045_s10, %s851_s29  ;;  %s856_s5 = sshll.u32 %s934_s30, 4  ;;  %s857_s5 = int_to_ptr.vmem [resolvable:$false] %s856_s5 }
  0x22   : > { %s858_s6 = scalar_lea.vmem %s857_s5, 256  ;;  %p859_p11 = scmp.lt.s32.totalorder %s1045_s10, %s857_s5 }
  0x23   : > { %p854_p4 = pnand %p852_p2, %p838_p3  ;;  %p860_p5 = scmp.lt.s32.totalorder %s858_s6, %s851_s29 }
  0x25   : > { %p855_p12 = pneg %p854_p4  ;;  %p861_p8 = por %p860_p5, %p859_p11 }
  0x27   : > { %p862_p9 = pnand %p861_p8, %p855_p12 }
  0x29   : > { %865 = shalt.err (!%p862_p9)
}
  0x2a   : > { %763 = dma.hbm_to_vmem [thread:$0]  (!%p1041_p13), %s1037_s8, 128, %s1045_s10, %s163_s12  }
  0x2b   : > { %p1351_p0 = scmp.lt.s32.totalorder %s932_s18, 3  ;;  %p1352_p1 = scmp.ge.s32.totalorder %s932_s18, 1 }
  0x2d   : > { %p180_p3 = pnand %p1352_p1, %p1351_p0 }
  0x2e   : > { %s1079_s7 = sand.u32 (!%p180_p3), 1, %s924_s16  }
  0x2f   : > { %183 = sbr.rel (%p180_p3) target bundleno = 519 (0x207), region = 36  ;;  %s747_s9 = sshll.u32 (!%p180_p3), %s1079_s7, 3 }
  0x30   : > { %s186_s13 = scalar_lea.sflag (!%p180_p3), [#allocation3], %s1079_s7  ;;  %s189_s11 = scalar_lea.vmem (!%p180_p3), [#allocation2], %s747_s9 }
  0x36   : > { %911 = dma.done.wait (%p1017_p6), %s186_s13, 128  }
  0x37   : > { %913 = vsyncadd (%p1017_p6), %s186_s13, 4294967168  ;;  %v935_v0 = vmov 0   ;;  %v936_v1 = vmov 2   ;;  %v215_v2 = vld [vmem:[%s1341_s1] sm:$0xff]  ;;  %v937_v3 = vmov 1   ;;  %v938_v4 = vmov 3  }
  0x38   : > { %815 = vset.pattern.permute.xlu0 %v935_v0  ;;  %817 = vset.pattern.permute.xlu1 %v936_v1  ;;  %v939_v5 = vmov 4   ;;  %v224_v6 = vlaneseq  ;;  %v214_v12 = vld [vmem:[%s189_s11] sm:$0xff]  ;;  %s940_s26 = smov 112   ;;  %s941_s12 = smov 16   ;;  %v943_v56 = vmov 7   ;;  %v945_v57 = vmov 5  }
  0x39   : > { %220 = vperm.xlu0 %815, %v215_v2   ;;  %271 = vperm.xlu1 %817, %v215_v2   ;;  %v216_v55 = vld [vmem:[%s1342_s2] sm:$0xff]  ;;  %s942_s22 = smov 127   ;;  %s944_s23 = smov 1   ;;  %v946_v58 = vmov 6   ;;  %v947_v59 = vmov 8  }
  0x3a   : > { %v225_v7 = vshrl.u32 %v224_v6, 7  ;;  %v1154_v60 = vand.u32 127, %v224_v6  ;;  %s755_s30 = sshll.u32 %s995_s19, 7  ;;  %s213_s5 = scalar_lea.vmem [#allocation5], %s747_s9 }
  0x3b   : > { %s670_s6 = sshll.u32 %s213_s5, 4  ;;  %s1296_s8 = scalar_lea.hbm %s1344_s4, %s755_s30  ;;  %s1298_s6 = int_to_ptr.vmem [resolvable:$true] %s670_s6 }
  0x3c   : > { %v1099_v8 = vsub.s32 0, %v225_v7  ;;  %v1101_v9 = vsub.s32 4, %v225_v7  ;;  %v1103_v10 = vsub.s32 1, %v225_v7  ;;  %v1105_v11 = vsub.s32 5, %v225_v7  ;;  %s656_s10 = scalar_lea.sflag [#allocation4], %s1079_s7  ;;  %p1361_p11 = scmp.ne.s32.totalorder %s1348_s27, 0 }
  0x3d   : > { %816 = vset.pattern.permute.xlu0 %v937_v3  ;;  %818 = vset.pattern.permute.xlu1 %v938_v4  ;;  %v1107_v13 = vsub.s32 2, %v225_v7  ;;  %v1109_v14 = vsub.s32 6, %v225_v7  ;;  %v1111_v15 = vsub.s32 3, %v225_v7  ;;  %v1113_v16 = vsub.s32 7, %v225_v7  ;;  %s948_s19 = smov [#allocation5]  }
  0x3e   : > { %245 = vperm.xlu0 %816, %v215_v2   ;;  %297 = vperm.xlu1 %818, %v215_v2   ;;  %v227_v17 = vrot.slane %v214_v12, %v1099_v8  ;;  %v231_v18 = vrot.slane %v214_v12, %v1101_v9  ;;  %v251_v19 = vrot.slane %v214_v12, %v1103_v10  ;;  %vm365_vm0 = vcmp.lt.s32.totalorder %v1154_v60, 112  ;;  %s870_s9 = sshll.u32 %s948_s19, 4  ;;  %s871_s9 = int_to_ptr.vmem [resolvable:$false] %s870_s9 }
  0x3f   : > { %v255_v20 = vrot.slane %v214_v12, %v1105_v11  ;;  %v277_v21 = vrot.slane %v214_v12, %v1107_v13  ;;  %v281_v22 = vrot.slane %v214_v12, %v1109_v14  ;;  %v303_v25 = vrot.slane %v214_v12, %v1111_v15  ;;  %p873_p7 = scmp.lt.s32.totalorder %s1298_s6, %s871_s9 }
  0x40   : > { %v307_v26 = vrot.slane %v214_v12, %v1113_v16  ;;  %v237_v27 = vrot.slane %v227_v17, %v1099_v8  ;;  %v241_v28 = vrot.slane %v231_v18, %v1099_v8  ;;  %v261_v29 = vrot.slane %v251_v19, %v1103_v10 }
  0x41   : > { %v265_v30 = vrot.slane %v255_v20, %v1103_v10  ;;  %v287_v31 = vrot.slane %v277_v21, %v1107_v13  ;;  %v291_v32 = vrot.slane %v281_v22, %v1107_v13  ;;  %v313_v33 = vrot.slane %v303_v25, %v1111_v15  ;;  %v217_v22 = vld [vmem:[%s1343_s3] sm:$0xf] }
  0x42   : > { %820 = vset.pattern.permute.xlu0 %v935_v0  ;;  %819 = vset.pattern.permute.xlu1 %v939_v5  ;;  %v317_v34 = vrot.slane %v307_v26, %v1111_v15  ;;  %vm357_vm1 = vcmp.lt.s32.totalorder %v1154_v60, 16  ;;  %v328_v18 = vadd.s32 128, %v1154_v60  ;;  %vm397_vm3 = vcmp.lt.s32.totalorder %v1154_v60, 127 }
  0x43   : > { %vm404_vm4 = vcmp.lt.s32.totalorder %v1154_v60, 1 }
  0x44   : > { %vm360_vm2 = vcmp.ge.s32.totalorder %v328_v18, 240 }
  0xb8   : > { %v221_v23 = vpop.permute.xlu0 %220  ;;  %v272_v24 = vpop.permute.xlu1 %271 }
  0xb9   : > { %v242_v37 = vmul.f32 %v237_v27, %v221_v23  ;;  %v243_v38 = vmul.f32 %v241_v28, %v221_v23  ;;  %v292_v41 = vmul.f32 %v287_v31, %v272_v24  ;;  %v293_v42 = vmul.f32 %v291_v32, %v272_v24 }
  0xba   : > { %v340_v28 = vand.u32 15, %v328_v18 }
  0xbc   : > { %vm1201_vm5 = vcmp.eq.s32.totalorder %v340_v28, 0  ;;  %vm1205_vm6 = vcmp.eq.s32.totalorder %v340_v28, 15 }
  0xbd   : > { %v246_v35 = vpop.permute.xlu0 %245  ;;  %v298_v36 = vpop.permute.xlu1 %297 }
  0xbe   : > { %v266_v39 = vmul.f32 %v261_v29, %v246_v35  ;;  %v267_v40 = vmul.f32 %v265_v30, %v246_v35  ;;  %v318_v45 = vmul.f32 %v313_v33, %v298_v36  ;;  %v319_v46 = vmul.f32 %v317_v34, %v298_v36 }
  0xbf   : > { %v333_v36 = vand.u32 15, %v1154_v60 }
  0xc0   : > { %v268_v43 = vadd.f32 %v266_v39, %v242_v37  ;;  %v269_v44 = vadd.f32 %v267_v40, %v243_v38 }
  0xc1   : > { %vm1218_vm7 = vcmp.eq.s32.totalorder %v333_v36, 0  ;;  %vm1222_vm8 = vcmp.eq.s32.totalorder %v333_v36, 15 }
  0xc2   : > { %v294_v47 = vadd.f32 %v292_v41, %v268_v43  ;;  %v295_v48 = vadd.f32 %v293_v42, %v269_v44 }
  0xc4   : > { %v320_v49 = vadd.f32 %v318_v45, %v294_v47  ;;  %v321_v50 = vadd.f32 %v319_v46, %v295_v48 }
  0xc6   : > { %v322_v51 = vmax.f32 %v320_v49, 0.0  ;;  %v323_v52 = vmax.f32 %v321_v50, 0.0 }
  0xc8   : > { %v1131_v53 = vmin.f32 %v322_v51, 6.0  ;;  %v1133_v54 = vmin.f32 %v323_v52, 6.0 }
  0xca   : > { %363 = vrot.lane.b32.xlu0 %v1133_v54, %s940_s26  ;;  %361 = vrot.lane.b32.xlu1 %v1131_v53, %s940_s26  ;;  %s866_s26 = scalar_lea.vmem %s1298_s6, 128 }
  0xcb   : > { %p867_p6 = scmp.ne.s32.totalorder %s1298_s6, %s866_s26 }
  0xcd   : > { %p868_p12 = pnand %p867_p6, %p1361_p11 }
  0xce   : > { %370 = vrot.lane.b32.xlu0 %v1133_v54, %s941_s12  ;;  %368 = vrot.lane.b32.xlu1 %v1131_v53, %s941_s12  ;;  %s872_s12 = scalar_lea.vmem %s871_s9, 256 }
  0xcf   : > { %p869_p13 = pneg %p868_p12  ;;  %p874_p10 = scmp.lt.s32.totalorder %s872_s12, %s866_s26 }
  0xd1   : > { %p875_p2 = por %p874_p10, %p873_p7 }
  0xd2   : > { %420 = vperm.xlu0 %820, %v216_v55   ;;  %388 = vperm.xlu1 %819, %v216_v55  }
  0xd3   : > { %p876_p4 = pnand %p875_p2, %p869_p13 }
  0xd6   : > { %823 = vset.pattern.permute.xlu0 %v938_v4  ;;  %821 = vset.pattern.permute.xlu1 %v937_v3 }
  0xd7   : > { %460 = vperm.xlu0 %823, %v216_v55   ;;  %428 = vperm.xlu1 %821, %v216_v55  }
  0xdb   : > { %443 = vrot.lane.b32.xlu0 %v1131_v53, %s942_s22  ;;  %822 = vset.pattern.permute.xlu1 %v936_v1 }
  0xdc   : > { %436 = vperm.xlu1 %822, %v216_v55   ;;  %826 = vset.pattern.permute.xlu0 %v943_v56 }
  0xdf   : > { %449 = vrot.lane.b32.xlu0 %v1131_v53, %s944_s23 }
  0xe0   : > { %824 = vset.pattern.permute.xlu1 %v945_v57 }
  0xe1   : > { %468 = vperm.xlu1 %824, %v216_v55  }
  0xe5   : > { %825 = vset.pattern.permute.xlu1 %v946_v58 }
  0xe6   : > { %492 = vperm.xlu1 %825, %v216_v55  }
  0xea   : > { %445 = vrot.lane.b32.xlu1 %v1133_v54, %s942_s22 }
  0xeb   : > { %827 = vset.pattern.permute.xlu1 %v947_v59 }
  0xee   : > { %451 = vrot.lane.b32.xlu1 %v1133_v54, %s944_s23 }
 0x13c   : > { %v364_v61 = vpop.permute.xlu0 %363  ;;  %v362_v62 = vpop.permute.xlu1 %361 }
 0x13d   : > { %v1160_v7 = vsel %vm365_vm0, %v362_v62, %v364_v61  ;;  %v367_v19 = vsel %vm365_vm0, %v364_v61, %v362_v62 }
 0x140   : > { %v371_v63 = vpop.permute.xlu0 %370  ;;  %v369_v2 = vpop.permute.xlu1 %368 }
 0x141   : > { %v1162_v12 = vsel %vm357_vm1, %v369_v2, %v371_v63  ;;  %v373_v17 = vsel %vm357_vm1, %v371_v63, %v369_v2 }
 0x142   : > { %395 = vrot.lane.b32.xlu1 %v1162_v12, %s942_s22  ;;  %v1167_v6 = vsel %vm357_vm1, %v1160_v7, %v373_v17  ;;  %v1181_v20 = vsel %vm360_vm2, %v1162_v12, %v367_v19 }
 0x143   : > { %393 = vrot.lane.b32.xlu0 %v1167_v6, %s942_s22 }
 0x146   : > { %402 = vrot.lane.b32.xlu1 %v1162_v12, %s944_s23 }
 0x147   : > { %400 = vrot.lane.b32.xlu0 %v1167_v6, %s944_s23 }
 0x14a   : > { %508 = vperm.xlu1 %827, %v216_v55  }
 0x14b   : > { %500 = vperm.xlu0 %826, %v216_v55  }
 0x14e   : > { %475 = vrot.lane.b32.xlu1 %v1160_v7, %s942_s22 }
 0x14f   : > { %477 = vrot.lane.b32.xlu0 %v1181_v20, %s942_s22  ;;  %828 = vset.pattern.permute.xlu1 %v935_v0 }
 0x150   : > { %829 = vset.pattern.permute.xlu0 %v937_v3 }
 0x151   : > { %v389_v21 = vpop.permute.xlu1 %388  ;;  %v421_v24 = vpop.permute.xlu0 %420 }
 0x152   : > { %481 = vrot.lane.b32.xlu1 %v1160_v7, %s944_s23  ;;  %v391_v46 = vmul.f32 %v389_v21, %v1131_v53  ;;  %v392_v50 = vmul.f32 %v389_v21, %v1133_v54 }
 0x153   : > { %483 = vrot.lane.b32.xlu0 %v1181_v20, %s944_s23 }
 0x156   : > { %521 = vperm.xlu1 %828, %v217_v22   ;;  %v429_v23 = vpop.permute.xlu1 %428  ;;  %v461_v25 = vpop.permute.xlu0 %460 }
 0x157   : > { %535 = vperm.xlu0 %829, %v217_v22  }
 0x15a   : > { %830 = vset.pattern.permute.xlu1 %v936_v1  ;;  %v444_v27 = vpop.permute.xlu0 %443 }
 0x15b   : > { %551 = vperm.xlu1 %830, %v217_v22   ;;  %832 = vset.pattern.permute.xlu0 %v939_v5  ;;  %v437_v0 = vpop.permute.xlu1 %436 }
 0x15c   : > { %583 = vperm.xlu0 %832, %v217_v22  }
 0x15e   : > { %v450_v29 = vpop.permute.xlu0 %449 }
 0x15f   : > { %831 = vset.pattern.permute.xlu1 %v938_v4 }
 0x160   : > { %567 = vperm.xlu1 %831, %v217_v22   ;;  %v469_v3 = vpop.permute.xlu1 %468  ;;  %835 = vset.pattern.permute.xlu0 %v943_v56  ;;  %v431_v56 = vmul.f32 %v429_v23, %v1167_v6 }
 0x161   : > { %631 = vperm.xlu0 %835, %v217_v22  }
 0x164   : > { %833 = vset.pattern.permute.xlu1 %v945_v57  ;;  %v432_v57 = vmul.f32 %v429_v23, %v1162_v12 }
 0x165   : > { %599 = vperm.xlu1 %833, %v217_v22   ;;  %v1197_v26 = vpop.permute.xlu1 %492 }
 0x169   : > { %834 = vset.pattern.permute.xlu1 %v946_v58  ;;  %v446_v1 = vpop.permute.xlu1 %445 }
 0x16a   : > { %615 = vperm.xlu1 %834, %v217_v22   ;;  %v448_v31 = vsel %vm397_vm3, %v446_v1, %v444_v27  ;;  %v447_v58 = vsel %vm397_vm3, %v444_v27, %v446_v1 }
 0x16d   : > { %v452_v30 = vpop.permute.xlu1 %451 }
 0x16e   : > { %v453_v32 = vsel %vm404_vm4, %v450_v29, %v452_v30  ;;  %v454_v51 = vsel %vm404_vm4, %v452_v30, %v450_v29 }
 0x16f   : > { %v456_v33 = vsel %vm1201_vm5, %v448_v31, %v453_v32  ;;  %v458_v34 = vsel %vm1205_vm6, %v453_v32, %v448_v31  ;;  %v455_v54 = vsel %vm1218_vm7, %v447_v58, %v454_v51  ;;  %v457_v6 = vsel %vm1222_vm8, %v454_v51, %v447_v58 }
 0x170   : > { %v463_v18 = vmul.f32 %v461_v25, %v455_v54  ;;  %v464_v19 = vmul.f32 %v461_v25, %v456_v33  ;;  %v471_v12 = vmul.f32 %v469_v3, %v457_v6  ;;  %v472_v23 = vmul.f32 %v469_v3, %v458_v34 }
 0x1b4   : > { %v396_v35 = vpop.permute.xlu1 %395 }
 0x1b5   : > { %v394_v37 = vpop.permute.xlu0 %393 }
 0x1b6   : > { %v398_v42 = vsel %vm397_vm3, %v394_v37, %v396_v35  ;;  %v399_v43 = vsel %vm397_vm3, %v396_v35, %v394_v37 }
 0x1b8   : > { %v403_v38 = vpop.permute.xlu1 %402 }
 0x1b9   : > { %v401_v41 = vpop.permute.xlu0 %400 }
 0x1ba   : > { %v405_v44 = vsel %vm404_vm4, %v401_v41, %v403_v38  ;;  %v406_v45 = vsel %vm404_vm4, %v403_v38, %v401_v41 }
 0x1bb   : > { %v411_v47 = vsel %vm1218_vm7, %v398_v42, %v406_v45  ;;  %v412_v48 = vsel %vm1201_vm5, %v399_v43, %v405_v44  ;;  %v418_v49 = vsel %vm1205_vm6, %v405_v44, %v399_v43  ;;  %v417_v53 = vsel %vm1222_vm8, %v406_v45, %v398_v42 }
 0x1bc   : > { %v423_v52 = vmul.f32 %v421_v24, %v411_v47  ;;  %v424_v55 = vmul.f32 %v421_v24, %v412_v48  ;;  %v439_v2 = vmul.f32 %v437_v0, %v417_v53  ;;  %v440_v17 = vmul.f32 %v437_v0, %v418_v49 }
 0x1be   : > { %v425_v59 = vadd.f32 %v423_v52, %v391_v46  ;;  %v426_v61 = vadd.f32 %v424_v55, %v392_v50 }
 0x1c0   : > { %v433_v62 = vadd.f32 %v431_v56, %v425_v59  ;;  %v434_v63 = vadd.f32 %v432_v57, %v426_v61 }
 0x1c2   : > { %v441_v21 = vadd.f32 %v439_v2, %v433_v62  ;;  %v442_v22 = vadd.f32 %v440_v17, %v434_v63 }
 0x1c4   : > { %v465_v24 = vadd.f32 %v463_v18, %v441_v21  ;;  %v466_v27 = vadd.f32 %v464_v19, %v442_v22 }
 0x1c6   : > { %v473_v28 = vadd.f32 %v471_v12, %v465_v24  ;;  %v474_v1 = vadd.f32 %v472_v23, %v466_v27 }
 0x1c9   : > { %v509_v29 = vpop.permute.xlu1 %508 }
 0x1ca   : > { %v501_v30 = vpop.permute.xlu0 %500 }
 0x1cb   : > { %v503_v60 = vmul.f32 %v501_v30, %v1160_v7  ;;  %v504_v45 = vmul.f32 %v501_v30, %v1181_v20 }
 0x1cd   : > { %v476_v31 = vpop.permute.xlu1 %475 }
 0x1ce   : > { %v478_v32 = vpop.permute.xlu0 %477 }
 0x1cf   : > { %v479_v0 = vsel %vm397_vm3, %v476_v31, %v478_v32  ;;  %v480_v25 = vsel %vm397_vm3, %v478_v32, %v476_v31 }
 0x1d1   : > { %v482_v35 = vpop.permute.xlu1 %481 }
 0x1d2   : > { %v484_v36 = vpop.permute.xlu0 %483 }
 0x1d3   : > { %v485_v33 = vsel %vm404_vm4, %v482_v35, %v484_v36  ;;  %v486_v3 = vsel %vm404_vm4, %v484_v36, %v482_v35 }
 0x1d4   : > { %v487_v34 = vsel %vm1218_vm7, %v479_v0, %v486_v3  ;;  %v488_v37 = vsel %vm1201_vm5, %v480_v25, %v485_v33  ;;  %v490_v38 = vsel %vm1205_vm6, %v485_v33, %v480_v25  ;;  %v489_v44 = vsel %vm1222_vm8, %v486_v3, %v479_v0 }
 0x1d5   : > { %v495_v41 = vmul.f32 %v1197_v26, %v487_v34  ;;  %v496_v42 = vmul.f32 %v1197_v26, %v488_v37  ;;  %v522_v43 = vpop.permute.xlu1 %521  ;;  %v511_v48 = vmul.f32 %v509_v29, %v489_v44  ;;  %v512_v49 = vmul.f32 %v509_v29, %v490_v38 }
 0x1d6   : > { %v536_v40 = vpop.permute.xlu0 %535 }
 0x1d7   : > { %v497_v39 = vadd.f32 %v495_v41, %v473_v28  ;;  %v498_v46 = vadd.f32 %v496_v42, %v474_v1 }
 0x1d9   : > { %v505_v47 = vadd.f32 %v503_v60, %v497_v39  ;;  %v506_v4 = vadd.f32 %v504_v45, %v498_v46 }
 0x1da   : > { %v552_v5 = vpop.permute.xlu1 %551 }
 0x1db   : > { %v513_v50 = vadd.f32 %v511_v48, %v505_v47  ;;  %v514_v51 = vadd.f32 %v512_v49, %v506_v4  ;;  %v584_v23 = vpop.permute.xlu0 %583 }
 0x1dd   : > { %v515_v52 = vmax.f32 %v513_v50, 0.0  ;;  %v516_v55 = vmax.f32 %v514_v51, 0.0 }
 0x1df   : > { %v517_v26 = vmin.f32 %v515_v52, 6.0  ;;  %v518_v56 = vmin.f32 %v516_v55, 6.0  ;;  %v568_v53 = vpop.permute.xlu1 %567 }
 0x1e1   : > { %v527_v57 = vrot.slane %v517_v26, %v1099_v8  ;;  %v531_v7 = vrot.slane %v518_v56, %v1099_v8  ;;  %v541_v20 = vrot.slane %v517_v26, %v1103_v10  ;;  %v545_v58 = vrot.slane %v518_v56, %v1103_v10 }
 0x1e2   : > { %v557_v59 = vrot.slane %v517_v26, %v1107_v13  ;;  %v561_v61 = vrot.slane %v518_v56, %v1107_v13  ;;  %v589_v18 = vrot.slane %v517_v26, %v1101_v9  ;;  %v593_v19 = vrot.slane %v518_v56, %v1101_v9 }
 0x1e3   : > { %v532_v54 = vmul.f32 %v527_v57, %v522_v43  ;;  %v533_v62 = vmul.f32 %v531_v7, %v522_v43  ;;  %v546_v63 = vmul.f32 %v541_v20, %v536_v40  ;;  %v547_v2 = vmul.f32 %v545_v58, %v536_v40 }
 0x1e4   : > { %v562_v17 = vmul.f32 %v557_v59, %v552_v5  ;;  %v563_v6 = vmul.f32 %v561_v61, %v552_v5  ;;  %v600_v21 = vpop.permute.xlu1 %599  ;;  %v573_v12 = vrot.slane %v517_v26, %v1111_v15  ;;  %v577_v10 = vrot.slane %v518_v56, %v1111_v15 }
 0x1e5   : > { %v548_v8 = vadd.f32 %v546_v63, %v532_v54  ;;  %v549_v22 = vadd.f32 %v547_v2, %v533_v62  ;;  %v605_v1 = vrot.slane %v517_v26, %v1105_v11  ;;  %v609_v29 = vrot.slane %v518_v56, %v1105_v11  ;;  %v632_v11 = vpop.permute.xlu0 %631 }
 0x1e6   : > { %v578_v27 = vmul.f32 %v573_v12, %v568_v53  ;;  %v579_v28 = vmul.f32 %v577_v10, %v568_v53  ;;  %v594_v30 = vmul.f32 %v589_v18, %v584_v23  ;;  %v595_v31 = vmul.f32 %v593_v19, %v584_v23 }
 0x1e7   : > { %v564_v24 = vadd.f32 %v562_v17, %v548_v8  ;;  %v565_v13 = vadd.f32 %v563_v6, %v549_v22  ;;  %v637_v35 = vrot.slane %v517_v26, %v1113_v16  ;;  %v641_v36 = vrot.slane %v518_v56, %v1113_v16 }
 0x1e8   : > { %v610_v0 = vmul.f32 %v605_v1, %v600_v21  ;;  %v611_v25 = vmul.f32 %v609_v29, %v600_v21  ;;  %v621_v34 = vrot.slane %v517_v26, %v1109_v14  ;;  %v625_v37 = vrot.slane %v518_v56, %v1109_v14 }
 0x1e9   : > { %v580_v32 = vadd.f32 %v578_v27, %v564_v24  ;;  %v581_v9 = vadd.f32 %v579_v28, %v565_v13  ;;  %v616_v15 = vpop.permute.xlu1 %615  ;;  %v642_v44 = vmul.f32 %v637_v35, %v632_v11  ;;  %v643_v60 = vmul.f32 %v641_v36, %v632_v11 }
 0x1ea   : > { %v626_v42 = vmul.f32 %v621_v34, %v616_v15  ;;  %v627_v43 = vmul.f32 %v625_v37, %v616_v15 }
 0x1eb   : > { %v596_v33 = vadd.f32 %v594_v30, %v580_v32  ;;  %v597_v3 = vadd.f32 %v595_v31, %v581_v9 }
 0x1ed   : > { %v612_v38 = vadd.f32 %v610_v0, %v596_v33  ;;  %v613_v41 = vadd.f32 %v611_v25, %v597_v3 }
 0x1ef   : > { %v628_v16 = vadd.f32 %v626_v42, %v612_v38  ;;  %v629_v45 = vadd.f32 %v627_v43, %v613_v41 }
 0x1f1   : > { %v644_v39 = vadd.f32 %v642_v44, %v628_v16  ;;  %v645_v46 = vadd.f32 %v643_v60, %v629_v45 }
 0x1f3   : > { %v646_v47 = vmax.f32 %v644_v39, 0.0  ;;  %v647_v4 = vmax.f32 %v645_v46, 0.0 }
 0x1f5   : > { %v648_v14 = vmin.f32 %v646_v47, 6.0  ;;  %v649_v48 = vmin.f32 %v647_v4, 6.0 }
 0x1f7   : > { %v652_v49 = vcombine.low %v648_v14, %v649_v48 }
 0x1f9   : > { %654 = vst [vmem:[%s213_s5] sm:$0xff] %v652_v49 }
 0x1fa   : > { %879 = shalt.err (!%p876_p4)
}
 0x1fb   : > { %s880_s7 = scalar_lea.hbm %s1296_s8, 128  ;;  %s884_s22 = scalar_lea.hbm %s1344_s4, 256 }
 0x1fc   : > { %p881_p5 = scmp.ne.s32.totalorder %s1296_s8, %s880_s7  ;;  %p885_p0 = scmp.lt.u32.totalorder %s1296_s8, %s1344_s4 }
 0x1fd   : > { %p886_p1 = scmp.lt.u32.totalorder %s884_s22, %s880_s7  ;;  %p888_p6 = scmp.lt.u32.totalorder %s880_s7, %s1296_s8 }
 0x1fe   : > { %p882_p8 = pnand %p881_p5, %p1361_p11 }
 0x1ff   : > { %p887_p3 = por %p886_p1, %p885_p0 }
 0x200   : > { %p883_p9 = pneg %p882_p8 }
 0x201   : > { %p889_p12 = por %p888_p6, %p887_p3 }
 0x203   : > { %p890_p13 = pnand %p889_p12, %p883_p9 }
 0x205   : > { %893 = shalt.err (!%p890_p13)
}
 0x206   : > { %758 = dma.vmem_to_hbm [thread:$0]  (%p1361_p11), %s1298_s6, 128, %s1296_s8, %s656_s10  }
 0x207 PF: > { %s682_s29 = sand.u32 1, %s920_s15   ;;  %p1362_p7 = scmp.ne.s32.totalorder %s1349_s28, 0 }
 0x208   : > { %p1363_p10 = scmp.ge.s32.totalorder %s932_s18, 2  ;;  %s683_s30 = scalar_lea.sflag [#allocation4], %s682_s29 }
 0x20a   : > { %p765_p2 = pnand %p1363_p10, %p1362_p7 }
 0x20c   : > { %915 = dma.done.wait (!%p765_p2), %s683_s30, 128  }
 0x20d   : > { %917 = vsyncadd (!%p765_p2), %s683_s30, 4294967168  ;;  %p17_p4 = scmp.ge.s32.totalorder %s999_s21, 4   ;;  %s1364_s15 = smov %s924_s16 }
 0x20e   : > { %s1365_s16 = smov %s928_s17  ;;  %s1366_s17 = smov %s1011_s24 }
 0x20f   : > { %s1367_s18 = smov %s999_s21  ;;  %19 = sbr.rel (!%p17_p4) target bundleno = 5 (0x5), region = 81 }
 0x216   :  { %688 = vsyncpa [#allocation3], 1 }
 0x217   :  { %690 = vsyncpa [#allocation3 + $0x1], 1 }
 0x218   :  { %691 = vsyncpa [#allocation4], 1 }
 0x219   :  { %693 = vsyncpa [#allocation4 + $0x1], 1 }

</bundles_post_ra>
